<compile_context>
chip_gen: v5e
topology: v5e:2x2
jax: 0.10.0
libtpu: 0.0.40
codegen_flags: <defaults>
</compile_context>

<pallas_src>
import jax
import jax.numpy as jnp
from jax.experimental import pallas as pl
from jax.experimental.pallas import tpu as pltpu


def _round_up(x, m):
    return ((x + m - 1) // m) * m


def _ceil_div(a, b):
    return -(-a // b)


def _outconv_kernel(x_ref, w_ref, b_ref, o_ref):
    # x_ref: (C_in, tm)    one batch element, one pixel tile (lane axis = pixels)
    # w_ref: (C_out, C_in) resident (constant index_map)
    # b_ref: (C_out, 1)    resident
    # o_ref: (C_out, tm)   lane-dense output tile
    acc = jnp.dot(w_ref[...], x_ref[...], preferred_element_type=jnp.float32)
    o_ref[...] = (acc + b_ref[...]).astype(o_ref.dtype)


def outconv_pallas(x_nchw, weight, bias, *, max_tile=65536):
    """1x1 Conv2d forward (PyTorch OutConv semantics), NCHW in / NCHW out.

    x_nchw: (N, C_in, H, W) float32
    weight: (C_out, C_in, 1, 1) float32  (PyTorch conv weight layout)
    bias:   (C_out,) float32
    returns (N, C_out, H, W) float32
    """
    N, C_in, H, W = x_nchw.shape
    C_out = weight.shape[0]
    HW = H * W

    # NCHW -> (N, C_in, HW): pure reshape, no transpose, pixels land on lanes.
    x = x_nchw.reshape(N, C_in, HW)
    w_mat = weight.reshape(C_out, C_in)   # (C_out, C_in)
    b_col = bias.reshape(C_out, 1)        # (C_out, 1)

    # ---- pixel-tile selection -------------------------------------------
    # Keep the tile a multiple of 128 lanes (BlockSpec constraint) and as
    # large as possible; never fall back to tiny tiles when HW is awkward —
    # the ragged last tile is masked by Pallas, so tm need not divide HW.
    max_tile = max(128, (max_tile // 128) * 128)
    tm = min(_round_up(HW, 128), max_tile)
    num_tiles = _ceil_div(HW, tm)

    # v7x megacore: make sure both TensorCores get work when the whole image
    # fits in one tile and there is only a single batch element.
    if N * num_tiles < 2 and HW > 128:
        tm = max(128, _round_up(_ceil_div(HW, 2), 128))
        num_tiles = _ceil_div(HW, tm)

    grid = (N, num_tiles)

    out = pl.pallas_call(
        _outconv_kernel,
        out_shape=jax.ShapeDtypeStruct((N, C_out, HW), x_nchw.dtype),
        grid_spec=pltpu.PrefetchScalarGridSpec(
            num_scalar_prefetch=0,
            grid=grid,
            in_specs=[
                # Batch dim squeezed out of the kernel view; pixel tile on lanes.
                pl.BlockSpec((None, C_in, tm), lambda n, p: (n, 0, p)),
                # Weight/bias: constant index_map -> stay resident in VMEM.
                pl.BlockSpec((C_out, C_in), lambda n, p: (0, 0)),
                pl.BlockSpec((C_out, 1), lambda n, p: (0, 0)),
            ],
            # Ragged last pixel tile: out-of-bounds columns are masked on store.
            out_specs=pl.BlockSpec((None, C_out, tm), lambda n, p: (n, 0, p)),
        ),
        compiler_params=pltpu.CompilerParams(
            dimension_semantics=("parallel", "parallel"),
            vmem_limit_bytes=32 * 1024 * 1024,
        ),
    )(x, w_mat, b_col)

    return out.reshape(N, C_out, H, W)


if __name__ == "__main__":
    key = jax.random.PRNGKey(0)
    k_x, k_w, k_b = jax.random.split(key, 3)

    N, C_in, C_out, S = 2, 4, 3, 16
    x = jax.random.normal(k_x, (N, C_in, S, S), dtype=jnp.float32)

    # Deterministic parameter init (mimics Conv2d kaiming-uniform bound 1/sqrt(fan_in)).
    fan_in = C_in * 1 * 1
    bound = 1.0 / (fan_in ** 0.5)
    weight = jax.random.uniform(k_w, (C_out, C_in, 1, 1), jnp.float32, -bound, bound)
    bias = jax.random.uniform(k_b, (C_out,), jnp.float32, -bound, bound)

    y = outconv_pallas(x, weight, bias)
    y = jax.block_until_ready(y)

    # Reference check in plain JAX (same math as torch's 1x1 conv).
    ref = jnp.einsum("nchw,oc->nohw", x, weight.reshape(C_out, C_in)) + bias[None, :, None, None]
    assert y.shape == (N, C_out, S, S)
    assert jnp.allclose(y, ref, atol=1e-5), "mismatch vs reference"

    print("KERNEL_OK")
</pallas_src>

<mosaic_0001>
module attributes {stable_mosaic.version = 11 : i64} {
  func.func @_outconv_kernel(%arg0: i32, %arg1: i32, %arg2: memref<1x4x256xf32, #tpu.memory_space<vmem>>, %arg3: memref<3x4xf32, #tpu.memory_space<vmem>>, %arg4: memref<3x1xf32, #tpu.memory_space<vmem>>, %arg5: memref<1x3x256xf32, #tpu.memory_space<vmem>>) attributes {dimension_semantics = [#tpu.dimension_semantics<parallel>, #tpu.dimension_semantics<parallel>], iteration_bounds = array<i64: 2, 1>, scalar_prefetch = 0 : i64, scratch_operands = 0 : i64, tpu.core_type = #tpu.core_type<tc>, window_params = [{transform_indices = @transform_0, window_bounds = array<i64: 1, 4, 256>}, {pipeline_mode = #tpu.pipeline_mode<synchronous>, transform_indices = @transform_1, window_bounds = array<i64: 3, 4>}, {pipeline_mode = #tpu.pipeline_mode<synchronous>, transform_indices = @transform_2, window_bounds = array<i64: 3, 1>}, {transform_indices = @transform_3, window_bounds = array<i64: 1, 3, 256>}]} {
    %c0 = arith.constant 0 : index
    %c0_0 = arith.constant 0 : index
    %0 = vector.load %arg3[%c0, %c0_0] : memref<3x4xf32, #tpu.memory_space<vmem>>, vector<3x4xf32>
    %c0_1 = arith.constant 0 : index
    %c0_2 = arith.constant 0 : index
    %c0_3 = arith.constant 0 : index
    %1 = vector.load %arg2[%c0_1, %c0_2, %c0_3] : memref<1x4x256xf32, #tpu.memory_space<vmem>>, vector<1x4x256xf32>
    %2 = vector.shape_cast %1 : vector<1x4x256xf32> to vector<4x256xf32>
    %cst = arith.constant dense<0.000000e+00> : vector<3x256xf32>
    %3 = tpu.matmul %0, %2, %cst {dimension_numbers = #tpu.dot_dimension_numbers<[1], [0], [0], [1], [0, 0, 1, 1], [], []>} : vector<3x4xf32>, vector<4x256xf32>, vector<3x256xf32> -> vector<3x256xf32>
    %c0_4 = arith.constant 0 : index
    %c0_5 = arith.constant 0 : index
    %4 = vector.load %arg4[%c0_4, %c0_5] : memref<3x1xf32, #tpu.memory_space<vmem>>, vector<3x1xf32>
    %5 = vector.broadcast %4 : vector<3x1xf32> to vector<3x256xf32>
    %6 = arith.addf %3, %5 : vector<3x256xf32>
    %c0_6 = arith.constant 0 : index
    %c0_7 = arith.constant 0 : index
    %c0_8 = arith.constant 0 : index
    %7 = vector.load %arg5[%c0_6, %c0_7, %c0_8] : memref<1x3x256xf32, #tpu.memory_space<vmem>>, vector<1x3x256xf32>
    %8 = vector.shape_cast %7 : vector<1x3x256xf32> to vector<3x256xf32>
    %9 = vector.shape_cast %6 : vector<3x256xf32> to vector<1x3x256xf32>
    tpu.vector_store %arg5[%c0_6, %c0_7, %c0_8], %9 {strides = array<i32>} : memref<1x3x256xf32, #tpu.memory_space<vmem>>, vector<1x3x256xf32>,
    return
  }
  func.func @transform_0(%arg0: i32, %arg1: i32) -> (i32, i32, i32) {
    %c0_i32 = arith.constant 0 : i32
    %c0_i32_0 = arith.constant 0 : i32
    return %arg0, %c0_i32, %arg1 : i32, i32, i32
  }
  func.func @transform_1(%arg0: i32, %arg1: i32) -> (i32, i32) {
    %c0_i32 = arith.constant 0 : i32
    %c0_i32_0 = arith.constant 0 : i32
    %c0_i32_1 = arith.constant 0 : i32
    return %c0_i32, %c0_i32_0 : i32, i32
  }
  func.func @transform_2(%arg0: i32, %arg1: i32) -> (i32, i32) {
    %c0_i32 = arith.constant 0 : i32
    %c0_i32_0 = arith.constant 0 : i32
    %c0_i32_1 = arith.constant 0 : i32
    return %c0_i32, %c0_i32_0 : i32, i32
  }
  func.func @transform_3(%arg0: i32, %arg1: i32) -> (i32, i32, i32) {
    %c0_i32 = arith.constant 0 : i32
    %c0_i32_0 = arith.constant 0 : i32
    return %arg0, %c0_i32, %arg1 : i32, i32, i32
  }
}

</mosaic_0001>

<bundles_post_ra>
// kernel: tpu_custom_call.1
= control target key start
LH: loop header
LB: loop body
LE: loop exit
PB: predicated region body
PF: predicated region fallthrough
CT: control target
= control target key end

     0   :  { %8 = vsyncpa [#allocation3], 0  ;;  %s657_s0 = inlined_call_operand.hbm [shape: f32[2,4,256], index: 0, kind: input, shape index: {}]   ;;  %s658_s1 = inlined_call_operand.vmem [shape: f32[3,4], index: 1, kind: input, shape index: {}]   ;;  %s659_s2 = inlined_call_operand.vmem [shape: f32[3,1], index: 2, kind: input, shape index: {}]   ;;  %s660_s3 = inlined_call_operand.vmem [shape: f32[2,3,256], index: 3, kind: output, shape index: {}]  }
   0x1   :  { %10 = vsyncpa [#allocation3 + $0x1], 0  ;;  %s560_s12 = smov 0   ;;  %s562_s13 = smov 0  }
   0x2   :  { %s564_s14 = smov 0   ;;  %s566_s15 = smov 0  }
   0x3   :  { %s568_s16 = smov 0   ;;  %s570_s17 = smov 0  }
   0x4 LB: > { %s381_s18 = sadd.s32 4294967295, %s537_s17   ;;  %s28_s19 = sadd.s32 1, %s533_s16  ;;  %s537_s17 = sphi %s570_s17, %s16_s17   ;;  %s533_s16 = sphi %s568_s16, %s667_s16   ;;  %s529_s15 = sphi %s566_s15, %s666_s15   ;;  %s525_s14 = sphi %s564_s14, %s665_s14   ;;  %s521_s13 = sphi %s562_s13, %s664_s13   ;;  %s517_s12 = sphi %s560_s12, %s663_s12  }
   0x5   : > { %p30_p0 = scmp.ge.s32.totalorder %s28_s19, 2  ;;  %s37_s20 = sadd.s32 1, %s525_s14 }
   0x6   : > { %p44_p1 = scmp.ne.s32.totalorder %s525_s14, %s521_s13  ;;  %p45_p2 = scmp.eq.s32.totalorder %s537_s17, 0 }
   0x7   : > { %s669_s19 = smov (%p30_p0, %s28_s19), 0  ;;  %p50_p4 = scmp.ne.s32.totalorder %s521_s13, %s517_s12 }
   0x8   : > { %p596_p3 = por %p45_p2, %p44_p1  ;;  %s32_s22 = ssub.s32 %s533_s16, %s669_s19 }
   0x9   : > { %p51_p5 = scmp.eq.s32.totalorder %s381_s18, 0  ;;  %p35_p6 = scmp.eq.s32.totalorder %s32_s22, 0 }
   0xa   : > { %p406_p8 = scmp.lt.s32.totalorder %s537_s17, 2  ;;  %s150_s25 = sand.u32 1, %s525_s14  }
   0xb   : > { %p603_p7 = por %p51_p5, %p50_p4  ;;  %s398_s26 = sshll.u32 %s533_s16, 3 }
   0xc   : > { %s609_s24 = scalar_select %p35_p6, %s525_s14, %s37_s20  }
   0xd   : > { %s385_s27 = sshll.u32 %s150_s25, 3  ;;  %s161_s30 = scalar_lea.hbm %s657_s0, %s398_s26 }
   0xe   : > { %s163_s4 = sshll.u32 %s161_s30, 4  ;;  %s154_s5 = scalar_lea.vmem [#allocation2], %s385_s27  ;;  %s164_s4 = int_to_ptr.hbm [resolvable:$true] %s163_s4 }
   0xf   : > { %s165_s6 = sshll.u32 %s154_s5, 4  ;;  %p403_p9 = pnand %p406_p8, %p596_p3  ;;  %s166_s6 = int_to_ptr.vmem [resolvable:$true] %s165_s6 }
  0x10   : > { %p388_p10 = scmp.ge.s32.totalorder %s537_s17, 1  ;;  %p170_p11 = scmp.lt.s32.totalorder %s537_s17, 3 }
  0x11   : > { %s151_s7 = scalar_lea.sflag [#allocation3], %s150_s25 }
  0x12   : > { %405 = dma.hbm_to_vmem [thread:$0]  (!%p403_p9), %s164_s4, 128, %s166_s6, %s151_s7  }
  0x13   : > { %p171_p12 = pnand %p388_p10, %p170_p11 }
  0x14   : > { %s176_s8 = sand.u32 (!%p171_p12), 1, %s521_s13  }
  0x15   : > { %174 = sbr.rel (%p171_p12) target bundleno = 169 (0xa9), region = 32  ;;  %s389_s9 = sshll.u32 (!%p171_p12), %s176_s8, 3 }
  0x16   : > { %s177_s10 = scalar_lea.sflag (!%p171_p12), [#allocation3], %s176_s8  ;;  %s180_s11 = scalar_lea.vmem (!%p171_p12), [#allocation2], %s389_s9 }
  0x1a   : > { %512 = dma.done.wait (%p603_p7), %s177_s10, 128  }
  0x1b   : > { %514 = vsyncadd (%p603_p7), %s177_s10, 4294967168  ;;  %v539_v0 = vmov 0   ;;  %v220_v1 = vld [vmem:[%s180_s11] sm:$0xff]  ;;  %v221_v2 = vld [vmem:[%s659_s2] sm:$0x7]  ;;  %vm235_vm0 = vcmask 1043456  }
  0x1c   : > { %456 = vset.pattern.permute.xlu0 %v539_v0  ;;  %228 = vst [vmem:[#allocation1] ss:$2 sm:$0xff] %v220_v1  ;;  %v219_v3 = vld [vmem:[%s658_s1] sm:$0x7]  ;;  %vm231_vm1 = vcmask 31744   ;;  %p210_p13 = scmp.lt.s32.totalorder %s529_s15, 1 }
  0x1d   : > { %224 = vperm.xlu0 %456, %v221_v2  }
  0x1e   : > { %s671_s15 = smov (!%p210_p13, %s529_s15), 1 }
  0x1f   : > { %s399_s22 = sshll.u32 %s671_s15, 3 }
  0x20   : > { %s217_s26 = scalar_lea.vmem %s660_s3, %s399_s22 }
  0x23   : > { %v229_v4 = vld.sshfl [vmem:[#allocation1] sm:$0xff pattern:$0x75316420]  ;;  %v230_v5 = vld.sshfl [vmem:[#allocation1 + $0x8] sm:$0xff pattern:$0x75316420] }
  0x24   : > { %392 = vmatpush.msk.msra.mxu0 %vm235_vm0, %v229_v4  ;;  %394 = vmatpush.msk.msra.mxu1 %vm235_vm0, %v230_v5 }
  0x25   : > { %393 = vmatmul.msk.f32.vlgmr.msra.gmra.mxu0 %vm231_vm1, %v219_v3  ;;  %395 = vmatmul.msk.f32.vlgmr.msra.gmra.mxu1 %vm231_vm1, %v219_v3 }
  0x8f   : > { %v225_v6 = vpop.permute.xlu0 %224 }
  0xa2   : > { %v257_v7 = vpop.f32.mrf.mxu0  ;;  %v277_v8 = vpop.f32.mrf.mxu1 }
  0xa3   : > { %v278_v9 = vadd.f32 %v277_v8, %v225_v6  ;;  %v258_v10 = vadd.f32 %v257_v7, %v225_v6 }
  0xa5   : > { %v282_v11 = vrot.slane %v278_v9, 4 }
  0xa7   : > { %v283_v12 = vsel %vm235_vm0, %v258_v10, %v282_v11 }
  0xa8   : > { %285 = vst [vmem:[%s217_s26] sm:$0x77] %v283_v12 }
  0xa9 PF: > { %s16_s17 = sadd.s32 1, %s537_s17   ;;  %s663_s12 = smov %s521_s13 }
  0xaa   : > { %p13_p0 = scmp.ge.s32.totalorder %s16_s17, 4   ;;  %s664_s13 = smov %s525_s14 }
  0xab   : > { %s665_s14 = smov %s609_s24  ;;  %s666_s15 = smov %s533_s16 }
  0xac   : > { %s667_s16 = smov %s669_s19  ;;  %15 = sbr.rel (!%p13_p0) target bundleno = 4 (0x4), region = 72 }
  0xb1   :  { %316 = vsyncpa [#allocation3], 1 }
  0xb2   :  { %318 = vsyncpa [#allocation3 + $0x1], 1 }

</bundles_post_ra>
